<compile_context>
chip_gen: v6e
topology: v6e:2x2x1
jax: 0.10.0
libtpu: 0.0.40
codegen_flags: <defaults>
</compile_context>

<pallas_src>
import jax
import jax.numpy as jnp
from jax import lax
from jax.experimental import pallas as pl
from jax.experimental.pallas import tpu as pltpu


def _pick_query_tile(hw: int) -> int:
    """Query-tile rows per grid step.  Full HW for small inputs; otherwise a
    multiple of 128 so the (tq, HW) f32 score tile stays a few MiB (fits the
    16/32/32 MiB scoped VMEM defaults of v5e/v6e/v7x) and block shapes satisfy
    the (8, 128) tiling rules."""
    if hw <= 256:
        return hw
    for t in (512, 256, 128):
        if hw % t == 0:
            return t
    return hw  # irregular spatial size: fall back to un-tiled


def _self_attention_kernel(xq_ref, xf_ref, mqk_ref, rqk_ref, wv_ref, bv_ref,
                           o_ref):
    # xq_ref : (1, TQ, C) f32  query-row tile of x (also the residual)
    # xf_ref : (1, HW, C) f32  full spatial extent of x (key/value side)
    # mqk_ref: (C, C)  bf16    Wq @ Wk^T   (fused Q/K projection)
    # rqk_ref: (1, C)  f32     bq @ Wk^T
    # wv_ref : (C, C)  bf16    value projection weight
    # bv_ref : (1, C)  f32     value projection bias
    # o_ref  : (1, TQ, C)
    xq_f32 = xq_ref[0]                                    # (TQ, C), residual
    xq = xq_f32.astype(jnp.bfloat16)
    xf = xf_ref[0].astype(jnp.bfloat16)                   # (HW, C)

    # Fused Q/K projection: a = x_q (Wq Wk^T) + bq Wk^T            (TQ, C)
    a = jnp.dot(xq, mqk_ref[...], preferred_element_type=jnp.float32)
    a = a + rqk_ref[...]

    # Value projection over the full spatial extent                 (HW, C)
    v = jnp.dot(xf, wv_ref[...], preferred_element_type=jnp.float32)
    v = v + bv_ref[...]

    # scores = a @ x^T : contraction over C, no materialized transpose.
    scores = lax.dot_general(a.astype(jnp.bfloat16), xf,
                             dimension_numbers=(((1,), (1,)), ((), ())),
                             preferred_element_type=jnp.float32)   # (TQ, HW)

    # Row-wise softmax; normalization deferred past the PV matmul.
    m = jnp.max(scores, axis=-1, keepdims=True)
    e = jnp.exp(scores - m)                                        # (TQ, HW)
    denom = jnp.sum(e, axis=-1, keepdims=True)                     # (TQ, 1)

    pv = jnp.dot(e.astype(jnp.bfloat16), v.astype(jnp.bfloat16),
                 preferred_element_type=jnp.float32)               # (TQ, C)

    out = pv * pl.reciprocal(denom, approx=True) + xq_f32
    # TODO(synk): emit the output in (B, C, HW) (lane-dense for HW >= 128) to
    # drop the wrapper-side output transpose; kept (HW, C) here for robustness.
    o_ref[0] = out.astype(o_ref.dtype)


def self_attention_pallas(x_nchw, wq, bq, wk, bk, wv, bv):
    """x_nchw: (B, C, H, W). wq/wk: (C, C//8), wv: (C, C); biases (1, ·)."""
    B, C, H, W = x_nchw.shape
    HW = H * W

    # NCHW -> (B, HW, C): spatial on sublanes, channels on lanes.
    x_flat = jnp.transpose(x_nchw.reshape(B, C, HW), (0, 2, 1))

    # Fold the Q and K projections into one (C, C) matrix and one (1, C) row.
    # bk contributes only a softmax-row-constant term -> dropped exactly.
    mqk = (wq @ wk.T).astype(jnp.bfloat16)               # (C, C)
    rqk = (bq @ wk.T).astype(jnp.float32)                # (1, C)
    wv_b = wv.astype(jnp.bfloat16)                       # (C, C)
    bv_f = bv.astype(jnp.float32)                        # (1, C)

    tq = _pick_query_tile(HW)
    nq = HW // tq

    flops = int(B * (2 * HW * C * C                      # fused Q/K projection
                     + 2 * nq * HW * C * C               # V projection per tile
                     + 4 * HW * HW * C))                 # scores + PV matmuls
    transcendentals = int(B * HW * HW)                   # exp
    bytes_accessed = int((2 + nq) * B * HW * C * 4       # x reads + out write
                         + 2 * (mqk.size + wv_b.size)
                         + 4 * (rqk.size + bv_f.size))

    out_flat = pl.pallas_call(
        _self_attention_kernel,
        out_shape=jax.ShapeDtypeStruct((B, HW, C), x_nchw.dtype),
        grid_spec=pltpu.PrefetchScalarGridSpec(
            num_scalar_prefetch=0,
            grid=(B, nq),
            in_specs=[
                pl.BlockSpec((1, tq, C), lambda b, q: (b, q, 0)),  # query tile
                pl.BlockSpec((1, HW, C), lambda b, q: (b, 0, 0)),  # k/v rows
                pl.BlockSpec((C, C), lambda b, q: (0, 0)),         # Wq Wk^T
                pl.BlockSpec((1, C), lambda b, q: (0, 0)),         # bq Wk^T
                pl.BlockSpec((C, C), lambda b, q: (0, 0)),         # Wv
                pl.BlockSpec((1, C), lambda b, q: (0, 0)),         # bv
            ],
            out_specs=pl.BlockSpec((1, tq, C), lambda b, q: (b, q, 0)),
        ),
        compiler_params=pltpu.CompilerParams(
            dimension_semantics=("parallel", "parallel"),
            vmem_limit_bytes=32 * 1024 * 1024),
        cost_estimate=pl.CostEstimate(
            flops=flops, transcendentals=transcendentals,
            bytes_accessed=bytes_accessed),
    )(x_flat, x_flat, mqk, rqk, wv_b, bv_f)

    # (B, HW, C) -> NCHW.
    # TODO(synk): the NCHW<->(B,HW,C) transposes could be removed entirely by
    # accepting/returning the (B, HW, C) layout from the caller.
    return jnp.transpose(out_flat, (0, 2, 1)).reshape(B, C, H, W)


def _reference(x_nchw, wq, bq, wk, bk, wv, bv):
    """Pure-JAX f32 reference mirroring the PyTorch forward exactly."""
    B, C, H, W = x_nchw.shape
    HW = H * W
    xf = x_nchw.reshape(B, C, HW)                                  # (B, C, HW)
    # conv1x1: out[b, o, p] = sum_c W[c, o] * x[b, c, p] + b[o]
    Q = jnp.einsum('bcp,co->bop', xf, wq) + bq.reshape(1, -1, 1)   # (B, Cq, HW)
    K = jnp.einsum('bcp,co->bop', xf, wk) + bk.reshape(1, -1, 1)
    V = jnp.einsum('bcp,co->bop', xf, wv) + bv.reshape(1, -1, 1)   # (B, C, HW)
    attn = jnp.einsum('bcq,bck->bqk', Q, K)                        # (B, HW, HW)
    attn = jax.nn.softmax(attn, axis=-1)
    out = jnp.einsum('bcj,bij->bci', V, attn)                      # (B, C, HW)
    return out.reshape(B, C, H, W) + x_nchw


if __name__ == "__main__":
    B, C, H, W = 2, 32, 8, 8
    Cq = C // 8

    key = jax.random.PRNGKey(0)
    kx, kq, kbq, kk, kbk, kv, kbv = jax.random.split(key, 7)

    x = jax.random.normal(kx, (B, C, H, W), dtype=jnp.float32)
    # Deterministic synthetic "conv1x1" weights, stored as (C_in, C_out).
    wq = jax.random.normal(kq, (C, Cq), dtype=jnp.float32) * 0.1
    bq = jax.random.normal(kbq, (1, Cq), dtype=jnp.float32) * 0.1
    wk = jax.random.normal(kk, (C, Cq), dtype=jnp.float32) * 0.1
    bk = jax.random.normal(kbk, (1, Cq), dtype=jnp.float32) * 0.1
    wv = jax.random.normal(kv, (C, C), dtype=jnp.float32) * 0.1
    bv = jax.random.normal(kbv, (1, C), dtype=jnp.float32) * 0.1

    out = self_attention_pallas(x, wq, bq, wk, bk, wv, bv)
    out = jax.block_until_ready(out)

    ref = _reference(x, wq, bq, wk, bk, wv, bv)
    assert out.shape == (B, C, H, W)
    # bf16 matmul inputs + approx reciprocal -> compare at bf16-level tolerance.
    assert jnp.allclose(out, ref, atol=5e-2, rtol=5e-2), \
        f"max abs err {jnp.max(jnp.abs(out - ref))}"

    print("KERNEL_OK")
</pallas_src>

<mosaic_0001>
module attributes {stable_mosaic.version = 11 : i64} {
  func.func @_self_attention_kernel(%arg0: i32, %arg1: i32, %arg2: memref<1x64x32xf32, #tpu.memory_space<vmem>>, %arg3: memref<1x64x32xf32, #tpu.memory_space<vmem>>, %arg4: memref<32x32xbf16, #tpu.memory_space<vmem>>, %arg5: memref<1x32xf32, #tpu.memory_space<vmem>>, %arg6: memref<32x32xbf16, #tpu.memory_space<vmem>>, %arg7: memref<1x32xf32, #tpu.memory_space<vmem>>, %arg8: memref<1x64x32xf32, #tpu.memory_space<vmem>>) attributes {dimension_semantics = [#tpu.dimension_semantics<parallel>, #tpu.dimension_semantics<parallel>], iteration_bounds = array<i64: 2, 1>, scalar_prefetch = 0 : i64, scratch_operands = 0 : i64, tpu.core_type = #tpu.core_type<tc>, window_params = [{transform_indices = @transform_0, window_bounds = array<i64: 1, 64, 32>}, {transform_indices = @transform_1, window_bounds = array<i64: 1, 64, 32>}, {pipeline_mode = #tpu.pipeline_mode<synchronous>, transform_indices = @transform_2, window_bounds = array<i64: 32, 32>}, {pipeline_mode = #tpu.pipeline_mode<synchronous>, transform_indices = @transform_3, window_bounds = array<i64: 1, 32>}, {pipeline_mode = #tpu.pipeline_mode<synchronous>, transform_indices = @transform_4, window_bounds = array<i64: 32, 32>}, {pipeline_mode = #tpu.pipeline_mode<synchronous>, transform_indices = @transform_5, window_bounds = array<i64: 1, 32>}, {transform_indices = @transform_6, window_bounds = array<i64: 1, 64, 32>}]} {
    %c0 = arith.constant 0 : index
    %c0_0 = arith.constant 0 : index
    %c0_1 = arith.constant 0 : index
    %0 = vector.load %arg2[%c0, %c0_0, %c0_1] : memref<1x64x32xf32, #tpu.memory_space<vmem>>, vector<1x64x32xf32>
    %1 = vector.shape_cast %0 : vector<1x64x32xf32> to vector<64x32xf32>
    %2 = arith.truncf %1 : vector<64x32xf32> to vector<64x32xbf16>
    %c0_2 = arith.constant 0 : index
    %c0_3 = arith.constant 0 : index
    %c0_4 = arith.constant 0 : index
    %3 = vector.load %arg3[%c0_2, %c0_3, %c0_4] : memref<1x64x32xf32, #tpu.memory_space<vmem>>, vector<1x64x32xf32>
    %4 = vector.shape_cast %3 : vector<1x64x32xf32> to vector<64x32xf32>
    %5 = arith.truncf %4 : vector<64x32xf32> to vector<64x32xbf16>
    %c0_5 = arith.constant 0 : index
    %c0_6 = arith.constant 0 : index
    %6 = vector.load %arg4[%c0_5, %c0_6] : memref<32x32xbf16, #tpu.memory_space<vmem>>, vector<32x32xbf16>
    %cst = arith.constant dense<0.000000e+00> : vector<64x32xf32>
    %7 = tpu.matmul %2, %6, %cst {dimension_numbers = #tpu.dot_dimension_numbers<[1], [0], [0], [1], [0, 0, 1, 1], [], []>} : vector<64x32xbf16>, vector<32x32xbf16>, vector<64x32xf32> -> vector<64x32xf32>
    %c0_7 = arith.constant 0 : index
    %c0_8 = arith.constant 0 : index
    %8 = vector.load %arg5[%c0_7, %c0_8] : memref<1x32xf32, #tpu.memory_space<vmem>>, vector<1x32xf32>
    %9 = vector.broadcast %8 : vector<1x32xf32> to vector<64x32xf32>
    %10 = arith.addf %7, %9 : vector<64x32xf32>
    %c0_9 = arith.constant 0 : index
    %c0_10 = arith.constant 0 : index
    %11 = vector.load %arg6[%c0_9, %c0_10] : memref<32x32xbf16, #tpu.memory_space<vmem>>, vector<32x32xbf16>
    %cst_11 = arith.constant dense<0.000000e+00> : vector<64x32xf32>
    %12 = tpu.matmul %5, %11, %cst_11 {dimension_numbers = #tpu.dot_dimension_numbers<[1], [0], [0], [1], [0, 0, 1, 1], [], []>} : vector<64x32xbf16>, vector<32x32xbf16>, vector<64x32xf32> -> vector<64x32xf32>
    %c0_12 = arith.constant 0 : index
    %c0_13 = arith.constant 0 : index
    %13 = vector.load %arg7[%c0_12, %c0_13] : memref<1x32xf32, #tpu.memory_space<vmem>>, vector<1x32xf32>
    %14 = vector.broadcast %13 : vector<1x32xf32> to vector<64x32xf32>
    %15 = arith.addf %12, %14 : vector<64x32xf32>
    %16 = arith.truncf %10 : vector<64x32xf32> to vector<64x32xbf16>
    %cst_14 = arith.constant dense<0.000000e+00> : vector<64x64xf32>
    %17 = tpu.matmul %16, %5, %cst_14 {dimension_numbers = #tpu.dot_dimension_numbers<[1], [1], [0], [0], [0, 0, 1, 0], [], []>} : vector<64x32xbf16>, vector<64x32xbf16>, vector<64x64xf32> -> vector<64x64xf32>
    %cst_15 = arith.constant dense<0xFF800000> : vector<64xf32>
    %18 = vector.multi_reduction <maximumf>, %17, %cst_15 [1] : vector<64x64xf32> to vector<64xf32>
    %19 = vector.shape_cast %18 : vector<64xf32> to vector<64x1xf32>
    %20 = vector.broadcast %19 : vector<64x1xf32> to vector<64x64xf32>
    %21 = arith.subf %17, %20 : vector<64x64xf32>
    %22 = math.exp %21 : vector<64x64xf32>
    %cst_16 = arith.constant dense<0.000000e+00> : vector<64xf32>
    %23 = vector.multi_reduction <add>, %22, %cst_16 [1] : vector<64x64xf32> to vector<64xf32>
    %24 = vector.shape_cast %23 : vector<64xf32> to vector<64x1xf32>
    %25 = arith.truncf %22 : vector<64x64xf32> to vector<64x64xbf16>
    %26 = arith.truncf %15 : vector<64x32xf32> to vector<64x32xbf16>
    %cst_17 = arith.constant dense<0.000000e+00> : vector<64x32xf32>
    %27 = tpu.matmul %25, %26, %cst_17 {dimension_numbers = #tpu.dot_dimension_numbers<[1], [0], [0], [1], [0, 0, 1, 1], [], []>} : vector<64x64xbf16>, vector<64x32xbf16>, vector<64x32xf32> -> vector<64x32xf32>
    %28 = tpu.reciprocal %24 {approx = true} : vector<64x1xf32> -> vector<64x1xf32>
    %29 = vector.broadcast %28 : vector<64x1xf32> to vector<64x32xf32>
    %30 = arith.mulf %27, %29 : vector<64x32xf32>
    %31 = arith.addf %30, %1 : vector<64x32xf32>
    %c0_18 = arith.constant 0 : index
    %c0_19 = arith.constant 0 : index
    %c0_20 = arith.constant 0 : index
    %32 = vector.load %arg8[%c0_18, %c0_19, %c0_20] : memref<1x64x32xf32, #tpu.memory_space<vmem>>, vector<1x64x32xf32>
    %33 = vector.shape_cast %32 : vector<1x64x32xf32> to vector<64x32xf32>
    %34 = vector.shape_cast %31 : vector<64x32xf32> to vector<1x64x32xf32>
    tpu.vector_store %arg8[%c0_18, %c0_19, %c0_20], %34 {strides = array<i32>} : memref<1x64x32xf32, #tpu.memory_space<vmem>>, vector<1x64x32xf32>,
    return
  }
  func.func @transform_0(%arg0: i32, %arg1: i32) -> (i32, i32, i32) {
    %c0_i32 = arith.constant 0 : i32
    %c0_i32_0 = arith.constant 0 : i32
    return %arg0, %arg1, %c0_i32 : i32, i32, i32
  }
  func.func @transform_1(%arg0: i32, %arg1: i32) -> (i32, i32, i32) {
    %c0_i32 = arith.constant 0 : i32
    %c0_i32_0 = arith.constant 0 : i32
    %c0_i32_1 = arith.constant 0 : i32
    return %arg0, %c0_i32, %c0_i32_0 : i32, i32, i32
  }
  func.func @transform_2(%arg0: i32, %arg1: i32) -> (i32, i32) {
    %c0_i32 = arith.constant 0 : i32
    %c0_i32_0 = arith.constant 0 : i32
    %c0_i32_1 = arith.constant 0 : i32
    return %c0_i32, %c0_i32_0 : i32, i32
  }
  func.func @transform_3(%arg0: i32, %arg1: i32) -> (i32, i32) {
    %c0_i32 = arith.constant 0 : i32
    %c0_i32_0 = arith.constant 0 : i32
    %c0_i32_1 = arith.constant 0 : i32
    return %c0_i32, %c0_i32_0 : i32, i32
  }
  func.func @transform_4(%arg0: i32, %arg1: i32) -> (i32, i32) {
    %c0_i32 = arith.constant 0 : i32
    %c0_i32_0 = arith.constant 0 : i32
    %c0_i32_1 = arith.constant 0 : i32
    return %c0_i32, %c0_i32_0 : i32, i32
  }
  func.func @transform_5(%arg0: i32, %arg1: i32) -> (i32, i32) {
    %c0_i32 = arith.constant 0 : i32
    %c0_i32_0 = arith.constant 0 : i32
    %c0_i32_1 = arith.constant 0 : i32
    return %c0_i32, %c0_i32_0 : i32, i32
  }
  func.func @transform_6(%arg0: i32, %arg1: i32) -> (i32, i32, i32) {
    %c0_i32 = arith.constant 0 : i32
    %c0_i32_0 = arith.constant 0 : i32
    return %arg0, %arg1, %c0_i32 : i32, i32, i32
  }
}

</mosaic_0001>

<bundles_post_ra>
// kernel: tpu_custom_call.1
= control target key start
LH: loop header
LB: loop body
LE: loop exit
PB: predicated region body
PF: predicated region fallthrough
CT: control target
= control target key end

     0   :  { %s1152_s21 = smov 0   ;;  %s1154_s22 = smov 0   ;;  %s1311_s0 = inlined_call_operand.vmem [shape: f32[2,64,32], index: 0, kind: input, shape index: {}]   ;;  %s1312_s1 = inlined_call_operand.vmem [shape: f32[2,64,32], index: 1, kind: input, shape index: {}]   ;;  %s1313_s2 = inlined_call_operand.vmem [shape: bf16[32,32], index: 2, kind: input, shape index: {}]   ;;  %s1314_s3 = inlined_call_operand.vmem [shape: f32[1,32], index: 3, kind: input, shape index: {}]   ;;  %s1315_s4 = inlined_call_operand.vmem [shape: bf16[32,32], index: 4, kind: input, shape index: {}]   ;;  %s1316_s5 = inlined_call_operand.vmem [shape: f32[1,32], index: 5, kind: input, shape index: {}]   ;;  %s1317_s6 = inlined_call_operand.vmem [shape: f32[2,64,32], index: 6, kind: output, shape index: {}]  }
   0x1   :  { %s1156_s23 = smov 0  }
   0x2 LB: > { %s28_s24 = sadd.s32 1, %s1111_s22  ;;  %p911_p0 = scmp.ge.s32.totalorder %s1115_s23, 1  ;;  %s1115_s23 = sphi %s1156_s23, %s16_s23   ;;  %s1111_s22 = sphi %s1154_s22, %s1319_s22   ;;  %s1107_s21 = sphi %s1152_s21, %s1318_s21  }
   0x3   : > { %p30_p1 = scmp.ge.s32.totalorder %s28_s24, 2  ;;  %p243_p2 = scmp.lt.s32.totalorder %s1115_s23, 3 }
   0x5   : > { %s1321_s24 = smov (%p30_p1, %s28_s24), 0  ;;  %p244_p3 = pnand %p911_p0, %p243_p2 }
   0x6   : > { %p287_p4 = scmp.lt.s32.totalorder (!%p244_p3), %s1107_s21, 1 }
   0x7   : > { %247 = sbr.rel (%p244_p3) target bundleno = 799 (0x31f), region = 44 }
   0xc   : > { %v1057_v0 = vld [vmem:[%s1313_s2 + $0x8] sm:$0xff]   ;;  %v1058_v1 = vld [vmem:[%s1313_s2] sm:$0xff]   ;;  %s1323_s21 = smov (!%p287_p4, %s1107_s21), 1  ;;  %vm359_vm0 = vcmask 261120   ;;  %vm618_vm1 = vcmask 523264  }
   0xd   : > { %973 = vmatprep.subr.bf16.mxu0 %v1057_v0  ;;  %s1176_s29 = sshll.u32 %s1323_s21, 6  ;;  %v1059_v30 = vld [vmem:[%s1315_s4 + $0x8] sm:$0xff]   ;;  %v1060_v31 = vld [vmem:[%s1315_s4] sm:$0xff]  }
   0xe   : > { %974 = vmatpush3.bf16.msra.mxu0 %v1057_v0  ;;  %s294_s8 = scalar_lea.vmem %s1311_s0, %s1176_s29  ;;  %s1186_s11 = scalar_lea.vmem %s1312_s1, %s1176_s29  ;;  %985 = vmatprep.subr.bf16.mxu1 %v1059_v30  ;;  %v918_v35 = vld [vmem:[%s1314_s3] ss:$0 sm:$0xff] }
   0xf   : > { %975 = vmatprep.subr.bf16.mxu0 %v1058_v1  ;;  %v1188_v2 = vld [vmem:[%s294_s8] sm:$0xff]  ;;  %v1190_v3 = vld [vmem:[%s294_s8 + $0x8] sm:$0xff]  ;;  %v1192_v4 = vld [vmem:[%s294_s8 + $0x10] sm:$0xff]  ;;  %986 = vmatpush3.bf16.msra.mxu1 %v1059_v30  ;;  %s1276_s25 = scalar_lea.vmem %s1317_s6, %s1176_s29 }
  0x10   : > { %v320_v5 = vpack.c.bf16 %v1190_v3, %v1188_v2  ;;  %v1196_v6 = vld [vmem:[%s294_s8 + $0x18] sm:$0xff]  ;;  %v1198_v7 = vld [vmem:[%s294_s8 + $0x20] sm:$0xff]  ;;  %v1200_v8 = vld [vmem:[%s294_s8 + $0x28] sm:$0xff]  ;;  %987 = vmatprep.subr.bf16.mxu1 %v1060_v31 }
  0x11   : > { %v321_v9 = vpack.c.bf16 %v1196_v6, %v1192_v4  ;;  %v322_v10 = vpack.c.bf16 %v1200_v8, %v1198_v7  ;;  %v330_v11 = vld [vmem:[%s1186_s11 + $0x30] sm:$0xff]  ;;  %v331_v12 = vld [vmem:[%s1186_s11 + $0x38] sm:$0xff]  ;;  %v328_v13 = vld [vmem:[%s1186_s11 + $0x20] sm:$0xff] }
  0x12   : > { %976 = vmatpush3.bf16.msra.mxu0 %v1058_v1  ;;  %977 = vmatprep.mubr.msk.bf16.mxu0 %vm359_vm0, %v320_v5  ;;  %v329_v14 = vld [vmem:[%s1186_s11 + $0x28] sm:$0xff]  ;;  %v335_v15 = vpack.c.bf16 %v331_v12, %v330_v11  ;;  %v1213_v17 = vld [vmem:[%s294_s8 + $0x30] sm:$0xff]  ;;  %v1215_v18 = vld [vmem:[%s294_s8 + $0x38] sm:$0xff] }
  0x13   : > { %v334_v16 = vpack.c.bf16 %v329_v14, %v328_v13  ;;  %v323_v20 = vpack.c.bf16 %v1215_v18, %v1213_v17  ;;  %v326_v21 = vld [vmem:[%s1186_s11 + $0x10] sm:$0xff]  ;;  %v327_v22 = vld [vmem:[%s1186_s11 + $0x18] sm:$0xff]  ;;  %v324_v26 = vld [vmem:[%s1186_s11] sm:$0xff]  ;;  %988 = vmatpush3.bf16.msra.mxu1 %v1060_v31 }
  0x14   : > { %1029 = vmatprep.subr.msk.bf16.mxu0 %vm359_vm0, %v335_v15  ;;  %v470_v19 = vsel %vm359_vm0, %v335_v15, 0  ;;  %v333_v24 = vpack.c.bf16 %v327_v22, %v326_v21  ;;  %v325_v27 = vld [vmem:[%s1186_s11 + $0x8] sm:$0xff]  ;;  %v925_v57 = vld [vmem:[%s1316_s5] ss:$0 sm:$0xff] }
  0x15   : > { %978 = vmatmul.mubr.msk.bf16.vlgmr.msra.gmra.mxu0 %vm359_vm0, %v321_v9  ;;  %v467_v23 = vsel %vm359_vm0, %v334_v16, 0  ;;  %v332_v28 = vpack.c.bf16 %v325_v27, %v324_v26 }
  0x16   : > { %981 = vmatprep.mubr.msk.bf16.mxu0 %vm359_vm0, %v322_v10  ;;  %998 = vmatpush3.bf16.xpose.msra.mxu0 %v470_v19  ;;  %v464_v25 = vsel %vm359_vm0, %v333_v24, 0 }
  0x17   : > { %1030 = vmatprep.subr.msk.bf16.mxu0 %vm359_vm0, %v334_v16  ;;  %v461_v29 = vsel %vm359_vm0, %v332_v28, 0  ;;  %989 = vmatprep.mubr.msk.bf16.mxu1 %vm359_vm0, %v332_v28 }
  0x18   : > { %990 = vmatmul.mubr.msk.bf16.vlgmr.msra.gmra.mxu1 %vm359_vm0, %v333_v24 }
  0x19   : > { %993 = vmatprep.mubr.msk.bf16.mxu1 %vm359_vm0, %v334_v16 }
  0x1d   : > { %982 = vmatmul.mubr.msk.bf16.gmra.mxu0 %vm359_vm0, %v323_v20 }
  0x1e   : > { %1000 = vmatpush3.bf16.xpose.msra.mxu0 %v467_v23 }
  0x1f   : > { %1031 = vmatprep.subr.msk.bf16.mxu0 %vm359_vm0, %v333_v24 }
  0x20   : > { %994 = vmatmul.mubr.msk.bf16.gmra.mxu1 %vm359_vm0, %v335_v15 }
  0x26   : > { %1002 = vmatpush3.bf16.xpose.msra.mxu0 %v464_v25 }
  0x27   : > { %1032 = vmatprep.subr.msk.bf16.mxu0 %vm359_vm0, %v332_v28 }
  0x2e   : > { %1004 = vmatpush3.bf16.xpose.msra.mxu0 %v461_v29 }
  0xd5   : > { %v979_v32 = vpop.f32.mrf.mxu0 }
  0xd6   : > { %v415_v40 = vadd.f32 %v979_v32, %v918_v35 }
  0xd7   : > { %v406_v33 = vpop.f32.mrf.mxu0 }
  0xd8   : > { %v407_v38 = vadd.f32 %v918_v35, %v406_v33  ;;  %v991_v53 = vpop.f32.mrf.mxu1 }
  0xd9   : > { %v980_v34 = vpop.f32.mrf.mxu0  ;;  %v515_v1 = vadd.f32 %v991_v53, %v925_v57 }
  0xda   : > { %v418_v36 = vadd.f32 %v980_v34, %v918_v35  ;;  %v506_v54 = vpop.f32.mrf.mxu1 }
  0xdb   : > { %v409_v37 = vpop.f32.mrf.mxu0  ;;  %v507_v12 = vadd.f32 %v925_v57, %v506_v54 }
  0xdc   : > { %v410_v39 = vadd.f32 %v918_v35, %v409_v37  ;;  %v538_v43 = vpack.c.bf16 %v418_v36, %v415_v40  ;;  %v992_v55 = vpop.f32.mrf.mxu1 }
  0xdd   : > { %v983_v41 = vpop.f32.mrf.mxu0  ;;  %v518_v5 = vadd.f32 %v992_v55, %v925_v57 }
  0xde   : > { %v537_v42 = vpack.c.bf16 %v410_v39, %v407_v38  ;;  %v431_v50 = vadd.f32 %v983_v41, %v918_v35  ;;  %v509_v56 = vpop.f32.mrf.mxu1 }
  0xdf   : > { %v422_v44 = vpop.f32.mrf.mxu0  ;;  %v696_v13 = vpack.c.bf16 %v518_v5, %v515_v1  ;;  %v510_v14 = vadd.f32 %v925_v57, %v509_v56 }
  0xe0   : > { %1005 = vmatprep.mubr.msk.bf16.mxu0 %vm359_vm0, %v537_v42  ;;  %v423_v48 = vadd.f32 %v918_v35, %v422_v44  ;;  %v995_v58 = vpop.f32.mrf.mxu1 }
  0xe1   : > { %v984_v45 = vpop.f32.mrf.mxu0  ;;  %1006 = vmatmul.mubr.msk.bf16.vlgmr.msra.gmra.mxu0 %vm359_vm0, %v538_v43  ;;  %v531_v60 = vadd.f32 %v995_v58, %v925_v57  ;;  %v695_v15 = vpack.c.bf16 %v510_v14, %v507_v12 }
  0xe2   : > { %v434_v46 = vadd.f32 %v984_v45, %v918_v35  ;;  %v522_v59 = vpop.f32.mrf.mxu1 }
  0xe3   : > { %v425_v47 = vpop.f32.mrf.mxu0  ;;  %v523_v62 = vadd.f32 %v925_v57, %v522_v59 }
  0xe4   : > { %v426_v49 = vadd.f32 %v918_v35, %v425_v47  ;;  %v540_v52 = vpack.c.bf16 %v434_v46, %v431_v50  ;;  %v996_v61 = vpop.f32.mrf.mxu1 }
  0xe5   : > { %v534_v63 = vadd.f32 %v996_v61, %v925_v57 }
  0xe6   : > { %v539_v51 = vpack.c.bf16 %v426_v49, %v423_v48  ;;  %v525_v0 = vpop.f32.mrf.mxu1 }
  0xe7   : > { %v698_v9 = vpack.c.bf16 %v534_v63, %v531_v60  ;;  %v526_v10 = vadd.f32 %v925_v57, %v525_v0 }
  0xe8   : > { %1009 = vmatprep.mubr.msk.bf16.mxu0 %vm359_vm0, %v539_v51 }
  0xe9   : > { %1010 = vmatmul.mubr.msk.bf16.gmra.mxu0 %vm359_vm0, %v540_v52  ;;  %v697_v11 = vpack.c.bf16 %v526_v10, %v523_v62  ;;  %1013 = vmatprep.subr.bf16.mxu1 %v698_v9 }
  0xea   : > { %1014 = vmatpush3.bf16.msra.mxu1 %v698_v9 }
  0xeb   : > { %1015 = vmatprep.subr.bf16.mxu1 %v697_v11 }
  0xee   : > { %1016 = vmatpush3.bf16.msra.mxu1 %v697_v11 }
  0xef   : > { %1017 = vmatprep.subr.bf16.mxu1 %v696_v13 }
  0xf2   : > { %1018 = vmatpush3.bf16.msra.mxu1 %v696_v13 }
  0xf3   : > { %1019 = vmatprep.subr.bf16.mxu1 %v695_v15 }
  0xf6   : > { %1020 = vmatpush3.bf16.msra.mxu1 %v695_v15 }
 0x1a1   : > { %v1007_v16 = vpop.f32.mrf.mxu0 }
 0x1a2   : > { %v625_v19 = vsel %vm618_vm1, %v1007_v16, -inf }
 0x1a3   : > { %626 = vmax.xlane.f32.xlu1 %v625_v19  ;;  %v587_v20 = vpop.f32.mrf.mxu0 }
 0x1a4   : > { %v619_v21 = vsel %vm618_vm1, %v587_v20, -inf }
 0x1a5   : > { %620 = vmax.xlane.f32.xlu0 %v619_v21  ;;  %v1008_v22 = vpop.f32.mrf.mxu0 }
 0x1a6   : > { %v628_v23 = vsel %vm618_vm1, %v1008_v22, -inf }
 0x1a7   : > { %629 = vmax.xlane.f32.xlu1 %v628_v23  ;;  %v590_v24 = vpop.f32.mrf.mxu0 }
 0x1a8   : > { %v622_v25 = vsel %vm618_vm1, %v590_v24, -inf }
 0x1a9   : > { %623 = vmax.xlane.f32.xlu0 %v622_v25  ;;  %v1011_v26 = vpop.f32.mrf.mxu0 }
 0x1aa   : > { %v637_v31 = vsel %vm618_vm1, %v1011_v26, -inf }
 0x1ab   : > { %v603_v27 = vpop.f32.mrf.mxu0 }
 0x1ac   : > { %v631_v28 = vsel %vm618_vm1, %v603_v27, -inf }
 0x1ad   : > { %632 = vmax.xlane.f32.xlu0 %v631_v28  ;;  %v1012_v29 = vpop.f32.mrf.mxu0 }
 0x1ae   : > { %v640_v33 = vsel %vm618_vm1, %v1012_v29, -inf }
 0x1af   : > { %v606_v30 = vpop.f32.mrf.mxu0 }
 0x1b0   : > { %v634_v32 = vsel %vm618_vm1, %v606_v30, -inf }
 0x1b1   : > { %638 = vmax.xlane.f32.xlu0 %v637_v31  ;;  %635 = vmax.xlane.f32.xlu1 %v634_v32 }
 0x1b5   : > { %641 = vmax.xlane.f32.xlu1 %v640_v33 }
 0x22c   : > { %v627_v34 = vpop.xlane.xlu1 %626 }
 0x22d   : > { %v645_v35 = vsub.f32 %v1007_v16, %v627_v34 }
 0x22e   : > { %v621_v36 = vpop.xlane.xlu0 %620 }
 0x22f   : > { %v655_v37 = vmul.f32 1.442695, %v645_v35  ;;  %v643_v38 = vsub.f32 %v587_v20, %v621_v36 }
 0x230   : > { %v630_v39 = vpop.xlane.xlu1 %629 }
 0x231   : > { %1061 = vpow2.f32 %v655_v37  ;;  %v651_v40 = vmul.f32 1.442695, %v643_v38  ;;  %v646_v41 = vsub.f32 %v1008_v22, %v630_v39 }
 0x232   : > { %v624_v42 = vpop.xlane.xlu0 %623 }
 0x233   : > { %1063 = vpow2.f32 %v651_v40  ;;  %v657_v43 = vmul.f32 1.442695, %v646_v41  ;;  %v644_v44 = vsub.f32 %v590_v24, %v624_v42 }
 0x235   : > { %1065 = vpow2.f32 %v657_v43  ;;  %v653_v45 = vmul.f32 1.442695, %v644_v44 }
 0x236   : > { %v633_v46 = vpop.xlane.xlu0 %632 }
 0x237   : > { %1067 = vpow2.f32 %v653_v45  ;;  %v647_v47 = vsub.f32 %v603_v27, %v633_v46 }
 0x239   : > { %v659_v48 = vmul.f32 1.442695, %v647_v47 }
 0x23a   : > { %v639_v49 = vpop.xlane.xlu0 %638  ;;  %v636_v50 = vpop.xlane.xlu1 %635 }
 0x23b   : > { %1069 = vpow2.f32 %v659_v48  ;;  %v649_v51 = vsub.f32 %v1011_v26, %v639_v49  ;;  %v648_v52 = vsub.f32 %v606_v30, %v636_v50 }
 0x23d   : > { %v663_v53 = vmul.f32 1.442695, %v649_v51  ;;  %v661_v54 = vmul.f32 1.442695, %v648_v52 }
 0x23e   : > { %v1062_v55 = vpop.eup %1061  ;;  %v642_v56 = vpop.xlane.xlu1 %641 }
 0x23f   : > { %1071 = vpow2.f32 %v663_v53  ;;  %v650_v57 = vsub.f32 %v1012_v29, %v642_v56  ;;  %v673_v58 = vsel %vm618_vm1, %v1062_v55, 0.0 }
 0x240   : > { %v1064_v59 = vpop.eup %1063  ;;  %1073 = vpow2.f32 %v661_v54  ;;  %674 = vadd.xlane.f32.xlu0 %v673_v58 }
 0x241   : > { %v665_v60 = vmul.f32 1.442695, %v650_v57  ;;  %v667_v62 = vsel %vm618_vm1, %v1064_v59, 0.0 }
 0x242   : > { %v1066_v61 = vpop.eup %1065 }
 0x243   : > { %1075 = vpow2.f32 %v665_v60  ;;  %v676_v63 = vsel %vm618_vm1, %v1066_v61, 0.0  ;;  %v692_v5 = vpack.c.bf16 %v1066_v61, %v1062_v55 }
 0x244   : > { %v1068_v0 = vpop.eup %1067  ;;  %668 = vadd.xlane.f32.xlu0 %v667_v62  ;;  %677 = vadd.xlane.f32.xlu1 %v676_v63 }
 0x245   : > { %v691_v1 = vpack.c.bf16 %v1068_v0, %v1064_v59  ;;  %v670_v9 = vsel %vm618_vm1, %v1068_v0, 0.0 }
 0x247   : > { %1021 = vmatprep.mubr.msk.bf16.mxu1 %vm618_vm1, %v691_v1 }
 0x248   : > { %v1070_v10 = vpop.eup %1069  ;;  %1022 = vmatmul.mubr.msk.bf16.vlgmr.msra.gmra.mxu1 %vm618_vm1, %v692_v5  ;;  %671 = vadd.xlane.f32.xlu1 %v670_v9 }
 0x249   : > { %v679_v11 = vsel %vm618_vm1, %v1070_v10, 0.0 }
 0x24a   : > { %680 = vadd.xlane.f32.xlu0 %v679_v11 }
 0x24c   : > { %v1072_v12 = vpop.eup %1071 }
 0x24d   : > { %v1074_v13 = vpop.eup %1073  ;;  %v685_v14 = vsel %vm618_vm1, %v1072_v12, 0.0 }
 0x24e   : > { %686 = vadd.xlane.f32.xlu0 %v685_v14  ;;  %v682_v15 = vsel %vm618_vm1, %v1074_v13, 0.0  ;;  %v693_v16 = vpack.c.bf16 %v1074_v13, %v1070_v10 }
 0x24f   : > { %683 = vadd.xlane.f32.xlu1 %v682_v15 }
 0x250   : > { %v1076_v19 = vpop.eup %1075  ;;  %1025 = vmatprep.mubr.msk.bf16.mxu1 %vm618_vm1, %v693_v16 }
 0x251   : > { %v688_v20 = vsel %vm618_vm1, %v1076_v19, 0.0  ;;  %v694_v21 = vpack.c.bf16 %v1076_v19, %v1072_v12 }
 0x253   : > { %689 = vadd.xlane.f32.xlu1 %v688_v20  ;;  %1026 = vmatmul.mubr.msk.bf16.gmra.mxu1 %vm618_vm1, %v694_v21 }
 0x2c9   : > { %v675_v22 = vpop.xlane.xlu0 %674 }
 0x2ca   : > { %1077 = vrcp.f32 %v675_v22 }
 0x2cd   : > { %v678_v23 = vpop.xlane.xlu1 %677  ;;  %v669_v24 = vpop.xlane.xlu0 %668 }
 0x2ce   : > { %1079 = vrcp.f32 %v669_v24 }
 0x2cf   : > { %1081 = vrcp.f32 %v678_v23 }
 0x2d1   : > { %v672_v25 = vpop.xlane.xlu1 %671 }
 0x2d2   : > { %1083 = vrcp.f32 %v672_v25 }
 0x2d3   : > { %v681_v26 = vpop.xlane.xlu0 %680 }
 0x2d7   : > { %v687_v28 = vpop.xlane.xlu0 %686  ;;  %v1078_v30 = vpop.eup %1077 }
 0x2d8   : > { %v684_v27 = vpop.xlane.xlu1 %683  ;;  %1085 = vrcp.f32 %v687_v28 }
 0x2d9   : > { %1087 = vrcp.f32 %v681_v26 }
 0x2db   : > { %v1080_v33 = vpop.eup %1079 }
 0x2dc   : > { %v690_v29 = vpop.xlane.xlu1 %689  ;;  %v1082_v37 = vpop.eup %1081 }
 0x2dd   : > { %1089 = vrcp.f32 %v690_v29 }
 0x2de   : > { %1091 = vrcp.f32 %v684_v27 }
 0x2df   : > { %v1084_v41 = vpop.eup %1083 }
 0x2e5   : > { %v1086_v45 = vpop.eup %1085 }
 0x2e6   : > { %v1088_v47 = vpop.eup %1087 }
 0x2ea   : > { %v1090_v51 = vpop.eup %1089 }
 0x2eb   : > { %v1092_v53 = vpop.eup %1091 }
 0x308   : > { %v1023_v31 = vpop.f32.mrf.mxu1 }
 0x309   : > { %v786_v32 = vmul.f32 %v1078_v30, %v1023_v31 }
 0x30a   : > { %v745_v34 = vpop.f32.mrf.mxu1 }
 0x30b   : > { %v794_v35 = vadd.f32 %v786_v32, %v1192_v4  ;;  %v784_v36 = vmul.f32 %v1080_v33, %v745_v34 }
 0x30c   : > { %v1024_v38 = vpop.f32.mrf.mxu1 }
 0x30d   : > { %802 = vst.msk [vmem:[%s1276_s25 + $0x10] sm:$0xff] %vm359_vm0, %v794_v35  ;;  %v792_v39 = vadd.f32 %v784_v36, %v1188_v2  ;;  %v787_v40 = vmul.f32 %v1082_v37, %v1024_v38 }
 0x30e   : > { %v748_v42 = vpop.f32.mrf.mxu1 }
 0x30f   : > { %800 = vst.msk [vmem:[%s1276_s25] sm:$0xff] %vm359_vm0, %v792_v39  ;;  %v795_v43 = vadd.f32 %v787_v40, %v1196_v6  ;;  %v785_v44 = vmul.f32 %v1084_v41, %v748_v42 }
 0x311   : > { %803 = vst.msk [vmem:[%s1276_s25 + $0x18] sm:$0xff] %vm359_vm0, %v795_v43  ;;  %v793_v4 = vadd.f32 %v785_v44, %v1190_v3 }
 0x313   : > { %801 = vst.msk [vmem:[%s1276_s25 + $0x8] sm:$0xff] %vm359_vm0, %v793_v4  ;;  %v1027_v46 = vpop.f32.mrf.mxu1 }
 0x314   : > { %v790_v2 = vmul.f32 %v1086_v45, %v1027_v46 }
 0x315   : > { %v761_v48 = vpop.f32.mrf.mxu1 }
 0x316   : > { %v798_v49 = vadd.f32 %v790_v2, %v1213_v17  ;;  %v788_v50 = vmul.f32 %v1088_v47, %v761_v48 }
 0x317   : > { %v1028_v6 = vpop.f32.mrf.mxu1 }
 0x318   : > { %806 = vst.msk [vmem:[%s1276_s25 + $0x30] sm:$0xff] %vm359_vm0, %v798_v49  ;;  %v796_v52 = vadd.f32 %v788_v50, %v1198_v7  ;;  %v791_v3 = vmul.f32 %v1090_v51, %v1028_v6 }
 0x319   : > { %v764_v54 = vpop.f32.mrf.mxu1 }
 0x31a   : > { %804 = vst.msk [vmem:[%s1276_s25 + $0x20] sm:$0xff] %vm359_vm0, %v796_v52  ;;  %v799_v55 = vadd.f32 %v791_v3, %v1215_v18  ;;  %v789_v56 = vmul.f32 %v1092_v53, %v764_v54 }
 0x31c   : > { %807 = vst.msk [vmem:[%s1276_s25 + $0x38] sm:$0xff] %vm359_vm0, %v799_v55  ;;  %v797_v57 = vadd.f32 %v789_v56, %v1200_v8 }
 0x31e   : > { %805 = vst.msk [vmem:[%s1276_s25 + $0x28] sm:$0xff] %vm359_vm0, %v797_v57 }
 0x31f PF: > { %s16_s23 = sadd.s32 1, %s1115_s23   ;;  %s1318_s21 = smov %s1111_s22 }
 0x320   : > { %p13_p5 = scmp.ge.s32.totalorder %s16_s23, 4   ;;  %s1319_s22 = smov %s1321_s24 }
 0x322   :  { %15 = sbr.rel (!%p13_p5) target bundleno = 2 (0x2), region = 77 }

</bundles_post_ra>
